<compile_context>
chip_gen: v6e
topology: v6e:2x2x1
jax: 0.10.0
libtpu: 0.0.40
codegen_flags: <defaults>
</compile_context>

<pallas_src>
import jax
import jax.numpy as jnp
from jax import lax
from jax.experimental import pallas as pl
from jax.experimental.pallas import tpu as pltpu

VOCAB = 5045
EMB_DIM = 50
N_OUT = 1
INIT_VARIANCE = -1.2  # the -1.2 passed to MLPBBPLayer(50, 1, -1.2)


def _softplus(x):
    # Numerically stable softplus: max(x, 0) + log1p(exp(-|x|)).
    return jnp.maximum(x, 0.0) + jnp.log1p(jnp.exp(-jnp.abs(x)))


def _pick_batch_tile(B: int) -> int:
    """Largest sublane-aligned batch tile that divides B and gives >=2 grid steps
    (so v7x's two TensorCores both get work on the 'parallel' batch axis).
    Tiny batches stay in a single full-dim block (always a legal block shape)."""
    if B < 16 or B % 8 != 0:
        return B
    for tb in (1024, 512, 256, 128, 64, 32, 16, 8):
        if tb <= B // 2 and B % tb == 0:
            return tb
    return B


def _bbp_kernel(idx_ref,                     # (B, S) int32 token ids, SMEM (scalar prefetch)
                table_ref,                   # (VOCAB, D) embedding table, resident VMEM
                w_mu_ref, w_rho_ref, eps_w_ref,   # (1, D) lane-dense
                b_mu_ref, b_rho_ref, eps_b_ref,   # (1, 1)
                out_ref,                     # (tb, 1)
                pooled_ref):                 # VMEM scratch (tb, D) f32
    tb, D = pooled_ref.shape
    S = idx_ref.shape[1]
    row0 = pl.program_id(0) * tb             # first batch row of this block

    # --- In-kernel embedding gather + sequence sum-pool --------------------------
    # (the mean's 1/S is folded into the sampled weight below)
    def row_body(r, carry):
        def tok_body(s, acc):
            tok = idx_ref[row0 + r, s]                               # SMEM scalar read
            return acc + table_ref[pl.ds(tok, 1), :].astype(jnp.float32)
        row_sum = lax.fori_loop(0, S, tok_body,
                                jnp.zeros((1, D), jnp.float32),
                                unroll=(S <= 16))
        pooled_ref[pl.ds(r, 1), :] = row_sum
        return carry

    lax.fori_loop(0, tb, row_body, 0)

    # --- Bayes-by-backprop reparameterized sample (lane-dense operands) ----------
    w = w_mu_ref[...] + _softplus(w_rho_ref[...]) * eps_w_ref[...]   # (1, D)
    b = b_mu_ref[...] + _softplus(b_rho_ref[...]) * eps_b_ref[...]   # (1, 1)
    w_scaled = w * (1.0 / S)                                         # fold mean-pool 1/S

    # --- VPU matvec: (tb, D) * (1, D) broadcast, lane reduce. No MXU for N=1. ----
    scores = jnp.sum(pooled_ref[...] * w_scaled, axis=-1, keepdims=True)   # (tb, 1)
    # NOTE: for very large B a lane-dense (1, B) output slab would avoid masked
    # last-dim-1 stores; at the tiny batches this model sees it is irrelevant.
    out_ref[...] = (scores + b).astype(out_ref.dtype)


def bbp_movie_forward(x_idx, params, eps_w, eps_b):
    """Forward pass. x_idx: (B, S) int32 token ids. Returns (B, 1) float32."""
    B, S = x_idx.shape
    V, D = params["emb_table"].shape
    tb = _pick_batch_tile(B)
    grid = (B // tb,)

    # Scalar-prefetch ref is passed positionally to every index_map.
    resident = lambda i, idx: (0, 0)          # weights/table stay resident every step

    # VMEM budget: table padded to ~(5048, 128) f32 ≈ 2.6 MiB (x2 buffers) + tiny
    # weight blocks + (tb, D) scratch — comfortably under the 16/32 MiB scoped
    # defaults on v5e/v6e/v7x, so no vmem_limit_bytes override is needed.
    # NOTE: scalar-prefetching the whole (B, S) id array into SMEM is only
    # appropriate for modest B*S; for huge batches switch to a blocked id input
    # or the per-token-score (table @ w first) formulation.
    out = pl.pallas_call(
        _bbp_kernel,
        out_shape=jax.ShapeDtypeStruct((B, N_OUT), jnp.float32),
        grid_spec=pltpu.PrefetchScalarGridSpec(
            num_scalar_prefetch=1,                      # x_idx -> SMEM
            grid=grid,
            in_specs=[
                pl.BlockSpec((V, D), resident),         # embedding table (full block)
                pl.BlockSpec((1, D), resident),         # W_mu   (lane-dense)
                pl.BlockSpec((1, D), resident),         # W_rho
                pl.BlockSpec((1, D), resident),         # eps_W
                pl.BlockSpec((1, N_OUT), resident),     # b_mu
                pl.BlockSpec((1, N_OUT), resident),     # b_rho
                pl.BlockSpec((1, N_OUT), resident),     # eps_b
            ],
            out_specs=pl.BlockSpec((tb, N_OUT), lambda i, idx: (i, 0)),
            scratch_shapes=[pltpu.VMEM((tb, D), jnp.float32)],
        ),
        compiler_params=pltpu.CompilerParams(
            dimension_semantics=("parallel",)),
    )(x_idx.astype(jnp.int32), params["emb_table"],
      params["W_mu"], params["W_rho"], eps_w,
      params["b_mu"], params["b_rho"], eps_b)
    return out


def init_params(key):
    k_emb, k_wmu, k_bmu = jax.random.split(key, 3)
    return {
        # nn.Embedding default init: N(0, 1)
        "emb_table": jax.random.normal(k_emb, (VOCAB, EMB_DIM), jnp.float32),
        # MLPBBPLayer init: W_mu ~ N(0, 0.1), W_rho = init_variance.
        # Stored lane-dense as (1, D) (transpose of PyTorch's (D, 1)) for TPU layout.
        "W_mu": 0.1 * jax.random.normal(k_wmu, (1, EMB_DIM), jnp.float32),
        "W_rho": jnp.full((1, EMB_DIM), INIT_VARIANCE, jnp.float32),
        "b_mu": 0.1 * jax.random.normal(k_bmu, (1, N_OUT), jnp.float32),
        "b_rho": jnp.full((1, N_OUT), INIT_VARIANCE, jnp.float32),
    }


if __name__ == "__main__":
    key = jax.random.PRNGKey(0)
    k_params, k_idx, k_ew, k_eb = jax.random.split(key, 4)

    params = init_params(k_params)

    B, S = 2, 8  # small batch of token-id sequences
    x_idx = jax.random.randint(k_idx, (B, S), 0, VOCAB, dtype=jnp.int32)

    # epsilon samples from get_random(1): N(0, 1), fixed here for determinism
    eps_w = jax.random.normal(k_ew, (1, EMB_DIM), jnp.float32)
    eps_b = jax.random.normal(k_eb, (1, N_OUT), jnp.float32)

    out = bbp_movie_forward(x_idx, params, eps_w, eps_b)
    out = jax.block_until_ready(out)

    # Pure-JAX reference for correctness (mirrors PyTorch BBPMovie.forward).
    emb_ref = jnp.take(params["emb_table"], x_idx, axis=0)                 # (B, S, D)
    pooled_ref = jnp.mean(emb_ref, axis=1)                                 # (B, D)
    w_ref = params["W_mu"] + jax.nn.softplus(params["W_rho"]) * eps_w      # (1, D)
    b_ref = params["b_mu"] + jax.nn.softplus(params["b_rho"]) * eps_b      # (1, 1)
    ref = pooled_ref @ w_ref.T + b_ref                                     # (B, 1)

    assert out.shape == (B, N_OUT), out.shape
    assert jnp.allclose(out, ref, atol=1e-5, rtol=1e-5), (out, ref)
    print("KERNEL_OK")
</pallas_src>

<mosaic_0001>
module attributes {stable_mosaic.version = 11 : i64} {
  func.func @_bbp_kernel(%arg0: i32, %arg1: memref<2x8xi32, #tpu.memory_space<smem>>, %arg2: memref<5045x50xf32, #tpu.memory_space<vmem>>, %arg3: memref<1x50xf32, #tpu.memory_space<vmem>>, %arg4: memref<1x50xf32, #tpu.memory_space<vmem>>, %arg5: memref<1x50xf32, #tpu.memory_space<vmem>>, %arg6: memref<1x1xf32, #tpu.memory_space<vmem>>, %arg7: memref<1x1xf32, #tpu.memory_space<vmem>>, %arg8: memref<1x1xf32, #tpu.memory_space<vmem>>, %arg9: memref<2x1xf32, #tpu.memory_space<vmem>>, %arg10: memref<2x50xf32, #tpu.memory_space<vmem>>) attributes {dimension_semantics = [#tpu.dimension_semantics<parallel>], iteration_bounds = array<i64: 1>, scalar_prefetch = 1 : i64, scratch_operands = 1 : i64, tpu.core_type = #tpu.core_type<tc>, window_params = [{pipeline_mode = #tpu.pipeline_mode<synchronous>, transform_indices = @transform_0, window_bounds = array<i64: 5045, 50>}, {pipeline_mode = #tpu.pipeline_mode<synchronous>, transform_indices = @transform_1, window_bounds = array<i64: 1, 50>}, {pipeline_mode = #tpu.pipeline_mode<synchronous>, transform_indices = @transform_2, window_bounds = array<i64: 1, 50>}, {pipeline_mode = #tpu.pipeline_mode<synchronous>, transform_indices = @transform_3, window_bounds = array<i64: 1, 50>}, {pipeline_mode = #tpu.pipeline_mode<synchronous>, transform_indices = @transform_4, window_bounds = array<i64: 1, 1>}, {pipeline_mode = #tpu.pipeline_mode<synchronous>, transform_indices = @transform_5, window_bounds = array<i64: 1, 1>}, {pipeline_mode = #tpu.pipeline_mode<synchronous>, transform_indices = @transform_6, window_bounds = array<i64: 1, 1>}, {transform_indices = @transform_7, window_bounds = array<i64: 2, 1>}]} {
    %c2_i32 = arith.constant 2 : i32
    %0 = arith.muli %arg0, %c2_i32 : i32
    %c0_i32 = arith.constant 0 : i32
    %c2_i32_0 = arith.constant 2 : i32
    %1 = arith.addi %c0_i32, %c2_i32_0 : i32
    %c1_i32 = arith.constant 1 : i32
    scf.for %arg11 = %c0_i32 to %1 step %c1_i32  : i32 {
      %cst_22 = arith.constant 0.000000e+00 : f32
      %38 = vector.broadcast %cst_22 : f32 to vector<1x50xf32>
      %c0_i32_23 = arith.constant 0 : i32
      %39 = arith.addi %0, %arg11 : i32
      %40 = arith.index_cast %39 : i32 to index
      %41 = arith.index_cast %c0_i32_23 : i32 to index
      %42 = memref.load %arg1[%40, %41] : memref<2x8xi32, #tpu.memory_space<smem>>
      %43 = arith.index_cast %42 : i32 to index
      %c0_24 = arith.constant 0 : index
      %44 = vector.load %arg2[%43, %c0_24] : memref<5045x50xf32, #tpu.memory_space<vmem>>, vector<1x50xf32>
      %45 = arith.addf %38, %44 : vector<1x50xf32>
      %c1_i32_25 = arith.constant 1 : i32
      %46 = arith.addi %0, %arg11 : i32
      %47 = arith.index_cast %46 : i32 to index
      %48 = arith.index_cast %c1_i32_25 : i32 to index
      %49 = memref.load %arg1[%47, %48] : memref<2x8xi32, #tpu.memory_space<smem>>
      %50 = arith.index_cast %49 : i32 to index
      %c0_26 = arith.constant 0 : index
      %51 = vector.load %arg2[%50, %c0_26] : memref<5045x50xf32, #tpu.memory_space<vmem>>, vector<1x50xf32>
      %52 = arith.addf %45, %51 : vector<1x50xf32>
      %c2_i32_27 = arith.constant 2 : i32
      %53 = arith.addi %0, %arg11 : i32
      %54 = arith.index_cast %53 : i32 to index
      %55 = arith.index_cast %c2_i32_27 : i32 to index
      %56 = memref.load %arg1[%54, %55] : memref<2x8xi32, #tpu.memory_space<smem>>
      %57 = arith.index_cast %56 : i32 to index
      %c0_28 = arith.constant 0 : index
      %58 = vector.load %arg2[%57, %c0_28] : memref<5045x50xf32, #tpu.memory_space<vmem>>, vector<1x50xf32>
      %59 = arith.addf %52, %58 : vector<1x50xf32>
      %c3_i32 = arith.constant 3 : i32
      %60 = arith.addi %0, %arg11 : i32
      %61 = arith.index_cast %60 : i32 to index
      %62 = arith.index_cast %c3_i32 : i32 to index
      %63 = memref.load %arg1[%61, %62] : memref<2x8xi32, #tpu.memory_space<smem>>
      %64 = arith.index_cast %63 : i32 to index
      %c0_29 = arith.constant 0 : index
      %65 = vector.load %arg2[%64, %c0_29] : memref<5045x50xf32, #tpu.memory_space<vmem>>, vector<1x50xf32>
      %66 = arith.addf %59, %65 : vector<1x50xf32>
      %c4_i32 = arith.constant 4 : i32
      %67 = arith.addi %0, %arg11 : i32
      %68 = arith.index_cast %67 : i32 to index
      %69 = arith.index_cast %c4_i32 : i32 to index
      %70 = memref.load %arg1[%68, %69] : memref<2x8xi32, #tpu.memory_space<smem>>
      %71 = arith.index_cast %70 : i32 to index
      %c0_30 = arith.constant 0 : index
      %72 = vector.load %arg2[%71, %c0_30] : memref<5045x50xf32, #tpu.memory_space<vmem>>, vector<1x50xf32>
      %73 = arith.addf %66, %72 : vector<1x50xf32>
      %c5_i32 = arith.constant 5 : i32
      %74 = arith.addi %0, %arg11 : i32
      %75 = arith.index_cast %74 : i32 to index
      %76 = arith.index_cast %c5_i32 : i32 to index
      %77 = memref.load %arg1[%75, %76] : memref<2x8xi32, #tpu.memory_space<smem>>
      %78 = arith.index_cast %77 : i32 to index
      %c0_31 = arith.constant 0 : index
      %79 = vector.load %arg2[%78, %c0_31] : memref<5045x50xf32, #tpu.memory_space<vmem>>, vector<1x50xf32>
      %80 = arith.addf %73, %79 : vector<1x50xf32>
      %c6_i32 = arith.constant 6 : i32
      %81 = arith.addi %0, %arg11 : i32
      %82 = arith.index_cast %81 : i32 to index
      %83 = arith.index_cast %c6_i32 : i32 to index
      %84 = memref.load %arg1[%82, %83] : memref<2x8xi32, #tpu.memory_space<smem>>
      %85 = arith.index_cast %84 : i32 to index
      %c0_32 = arith.constant 0 : index
      %86 = vector.load %arg2[%85, %c0_32] : memref<5045x50xf32, #tpu.memory_space<vmem>>, vector<1x50xf32>
      %87 = arith.addf %80, %86 : vector<1x50xf32>
      %c7_i32 = arith.constant 7 : i32
      %88 = arith.addi %0, %arg11 : i32
      %89 = arith.index_cast %88 : i32 to index
      %90 = arith.index_cast %c7_i32 : i32 to index
      %91 = memref.load %arg1[%89, %90] : memref<2x8xi32, #tpu.memory_space<smem>>
      %92 = arith.index_cast %91 : i32 to index
      %c0_33 = arith.constant 0 : index
      %93 = vector.load %arg2[%92, %c0_33] : memref<5045x50xf32, #tpu.memory_space<vmem>>, vector<1x50xf32>
      %94 = arith.addf %87, %93 : vector<1x50xf32>
      %c8_i32 = arith.constant 8 : i32
      %95 = arith.index_cast %arg11 : i32 to index
      %c0_34 = arith.constant 0 : index
      %96 = vector.load %arg10[%95, %c0_34] : memref<2x50xf32, #tpu.memory_space<vmem>>, vector<1x50xf32>
      tpu.vector_store %arg10[%95, %c0_34], %94 {strides = array<i32>} : memref<2x50xf32, #tpu.memory_space<vmem>>, vector<1x50xf32>,
    }
    %c2_i32_1 = arith.constant 2 : i32
    %c0 = arith.constant 0 : index
    %c0_2 = arith.constant 0 : index
    %2 = vector.load %arg3[%c0, %c0_2] : memref<1x50xf32, #tpu.memory_space<vmem>>, vector<1x50xf32>
    %c0_3 = arith.constant 0 : index
    %c0_4 = arith.constant 0 : index
    %3 = vector.load %arg4[%c0_3, %c0_4] : memref<1x50xf32, #tpu.memory_space<vmem>>, vector<1x50xf32>
    %cst = arith.constant 0.000000e+00 : f32
    %4 = vector.broadcast %cst : f32 to vector<1x50xf32>
    %5 = arith.maximumf %3, %4 : vector<1x50xf32>
    %6 = math.absf %3 : vector<1x50xf32>
    %cst_5 = arith.constant 0.000000e+00 : f32
    %7 = vector.broadcast %cst_5 : f32 to vector<1x50xf32>
    %8 = arith.subf %7, %6 : vector<1x50xf32>
    %9 = math.exp %8 : vector<1x50xf32>
    %10 = math.log1p %9 : vector<1x50xf32>
    %11 = arith.addf %5, %10 : vector<1x50xf32>
    %c0_6 = arith.constant 0 : index
    %c0_7 = arith.constant 0 : index
    %12 = vector.load %arg5[%c0_6, %c0_7] : memref<1x50xf32, #tpu.memory_space<vmem>>, vector<1x50xf32>
    %13 = arith.mulf %11, %12 : vector<1x50xf32>
    %14 = arith.addf %2, %13 : vector<1x50xf32>
    %c0_8 = arith.constant 0 : index
    %c0_9 = arith.constant 0 : index
    %15 = vector.load %arg6[%c0_8, %c0_9] : memref<1x1xf32, #tpu.memory_space<vmem>>, vector<1x1xf32>
    %c0_10 = arith.constant 0 : index
    %c0_11 = arith.constant 0 : index
    %16 = vector.load %arg7[%c0_10, %c0_11] : memref<1x1xf32, #tpu.memory_space<vmem>>, vector<1x1xf32>
    %cst_12 = arith.constant 0.000000e+00 : f32
    %17 = vector.broadcast %cst_12 : f32 to vector<1x1xf32>
    %18 = arith.maximumf %16, %17 : vector<1x1xf32>
    %19 = math.absf %16 : vector<1x1xf32>
    %cst_13 = arith.constant 0.000000e+00 : f32
    %20 = vector.broadcast %cst_13 : f32 to vector<1x1xf32>
    %21 = arith.subf %20, %19 : vector<1x1xf32>
    %22 = math.exp %21 : vector<1x1xf32>
    %23 = math.log1p %22 : vector<1x1xf32>
    %24 = arith.addf %18, %23 : vector<1x1xf32>
    %c0_14 = arith.constant 0 : index
    %c0_15 = arith.constant 0 : index
    %25 = vector.load %arg8[%c0_14, %c0_15] : memref<1x1xf32, #tpu.memory_space<vmem>>, vector<1x1xf32>
    %26 = arith.mulf %24, %25 : vector<1x1xf32>
    %27 = arith.addf %15, %26 : vector<1x1xf32>
    %cst_16 = arith.constant 1.250000e-01 : f32
    %28 = vector.broadcast %cst_16 : f32 to vector<1x50xf32>
    %29 = arith.mulf %14, %28 : vector<1x50xf32>
    %c0_17 = arith.constant 0 : index
    %c0_18 = arith.constant 0 : index
    %30 = vector.load %arg10[%c0_17, %c0_18] : memref<2x50xf32, #tpu.memory_space<vmem>>, vector<2x50xf32>
    %31 = vector.broadcast %29 : vector<1x50xf32> to vector<2x50xf32>
    %32 = arith.mulf %30, %31 : vector<2x50xf32>
    %cst_19 = arith.constant dense<0.000000e+00> : vector<2xf32>
    %33 = vector.multi_reduction <add>, %32, %cst_19 [1] : vector<2x50xf32> to vector<2xf32>
    %34 = vector.shape_cast %33 : vector<2xf32> to vector<2x1xf32>
    %35 = vector.broadcast %27 : vector<1x1xf32> to vector<2x1xf32>
    %36 = arith.addf %34, %35 : vector<2x1xf32>
    %c0_20 = arith.constant 0 : index
    %c0_21 = arith.constant 0 : index
    %37 = vector.load %arg9[%c0_20, %c0_21] : memref<2x1xf32, #tpu.memory_space<vmem>>, vector<2x1xf32>
    tpu.vector_store %arg9[%c0_20, %c0_21], %36 {strides = array<i32>} : memref<2x1xf32, #tpu.memory_space<vmem>>, vector<2x1xf32>,
    return
  }
  func.func @transform_0(%arg0: i32, %arg1: memref<2x8xi32, #tpu.memory_space<smem>>) -> (i32, i32) {
    %c0_i32 = arith.constant 0 : i32
    %c0_i32_0 = arith.constant 0 : i32
    %c0_i32_1 = arith.constant 0 : i32
    return %c0_i32, %c0_i32_0 : i32, i32
  }
  func.func @transform_1(%arg0: i32, %arg1: memref<2x8xi32, #tpu.memory_space<smem>>) -> (i32, i32) {
    %c0_i32 = arith.constant 0 : i32
    %c0_i32_0 = arith.constant 0 : i32
    %c0_i32_1 = arith.constant 0 : i32
    return %c0_i32, %c0_i32_0 : i32, i32
  }
  func.func @transform_2(%arg0: i32, %arg1: memref<2x8xi32, #tpu.memory_space<smem>>) -> (i32, i32) {
    %c0_i32 = arith.constant 0 : i32
    %c0_i32_0 = arith.constant 0 : i32
    %c0_i32_1 = arith.constant 0 : i32
    return %c0_i32, %c0_i32_0 : i32, i32
  }
  func.func @transform_3(%arg0: i32, %arg1: memref<2x8xi32, #tpu.memory_space<smem>>) -> (i32, i32) {
    %c0_i32 = arith.constant 0 : i32
    %c0_i32_0 = arith.constant 0 : i32
    %c0_i32_1 = arith.constant 0 : i32
    return %c0_i32, %c0_i32_0 : i32, i32
  }
  func.func @transform_4(%arg0: i32, %arg1: memref<2x8xi32, #tpu.memory_space<smem>>) -> (i32, i32) {
    %c0_i32 = arith.constant 0 : i32
    %c0_i32_0 = arith.constant 0 : i32
    %c0_i32_1 = arith.constant 0 : i32
    return %c0_i32, %c0_i32_0 : i32, i32
  }
  func.func @transform_5(%arg0: i32, %arg1: memref<2x8xi32, #tpu.memory_space<smem>>) -> (i32, i32) {
    %c0_i32 = arith.constant 0 : i32
    %c0_i32_0 = arith.constant 0 : i32
    %c0_i32_1 = arith.constant 0 : i32
    return %c0_i32, %c0_i32_0 : i32, i32
  }
  func.func @transform_6(%arg0: i32, %arg1: memref<2x8xi32, #tpu.memory_space<smem>>) -> (i32, i32) {
    %c0_i32 = arith.constant 0 : i32
    %c0_i32_0 = arith.constant 0 : i32
    %c0_i32_1 = arith.constant 0 : i32
    return %c0_i32, %c0_i32_0 : i32, i32
  }
  func.func @transform_7(%arg0: i32, %arg1: memref<2x8xi32, #tpu.memory_space<smem>>) -> (i32, i32) {
    %c0_i32 = arith.constant 0 : i32
    %c0_i32_0 = arith.constant 0 : i32
    return %arg0, %c0_i32 : i32, i32
  }
}

</mosaic_0001>

<bundles_post_ra>
// kernel: tpu_custom_call.1
= control target key start
LH: loop header
LB: loop body
LE: loop exit
PB: predicated region body
PF: predicated region fallthrough
CT: control target
= control target key end

     0   :  { %s314_s0 = inlined_call_operand.vmem [shape: s32[2,8], index: 0, kind: input, shape index: {}]   ;;  %s315_s1 = inlined_call_operand.vmem [shape: f32[5045,50], index: 1, kind: input, shape index: {}]   ;;  %s316_s2 = inlined_call_operand.vmem [shape: f32[1,50], index: 2, kind: input, shape index: {}]   ;;  %s317_s3 = inlined_call_operand.vmem [shape: f32[1,50], index: 3, kind: input, shape index: {}]   ;;  %s318_s4 = inlined_call_operand.vmem [shape: f32[1,50], index: 4, kind: input, shape index: {}]   ;;  %s319_s8 = inlined_call_operand.vmem [shape: f32[2,1], index: 8, kind: output, shape index: {}]   ;;  %s320_s5 = inlined_call_operand.<no memory space> [shape: f32[1,1], index: 5, kind: input, shape index: {}]   ;;  %s321_s6 = inlined_call_operand.<no memory space> [shape: f32[1,1], index: 6, kind: input, shape index: {}]   ;;  %s322_s7 = inlined_call_operand.<no memory space> [shape: f32[1,1], index: 7, kind: input, shape index: {}]  }
   0x1   :  { %s13_s29 = sshll.u32 %s314_s0, 4  ;;  %v17_v0 = vstv %s320_s5  ;;  %v19_v1 = vstv %s321_s6  ;;  %v21_v2 = vstv %s322_s7  ;;  %s14_s29 = int_to_ptr.vmem [resolvable:$true] %s13_s29 }
   0x2   :  { %18 = vst [vmem:[#allocation5] sm:$0x1] %v17_v0  ;;  %20 = vst [vmem:[#allocation6] sm:$0x1] %v19_v1  ;;  %s188_s14 = scalar_lea.vmem %s14_s29, 32  ;;  %p193_p1 = scmp.lt.s32.totalorder %s14_s29, %s14_s29 }
   0x3   :  { %22 = vst [vmem:[#allocation7] sm:$0x1] %v21_v2  ;;  %p189_p0 = scmp.ne.s32.totalorder %s14_s29, %s188_s14  ;;  %p194_p2 = scmp.lt.s32.totalorder %s188_s14, %s188_s14 }
   0x5   :  { %p195_p3 = por %p194_p2, %p193_p1 }
   0x7   :  { %p196_p4 = pnand %p195_p3, %p189_p0 }
   0x9   :  { %199 = shalt.err (!%p196_p4)  }
   0xa   :  { %s210_s0 = smov [#allocation4]  }
   0xb   :  { %16 = dma.vmem_to_smem %s14_s29, 32, %s210_s0, [#allocation3] }
   0xc   :  { %204 = dma.done.wait [#allocation3], 32 }
   0xd   :  { %205 = vsyncadd [#allocation3], 4294967264 }
   0xe   :  { %24 = sfence }
   0xf   :  { %s268_s5 = smov 0  }
  0x10 LB: > { %s170_s6 = sshll.u32 %s208_s5, 7  ;;  %vm88_vm0 = vcmask 401408   ;;  %s208_s5 = sphi %s268_s5, %s45_s5  }
  0x11   : > { %s48_s7 = sld [smem:[#allocation4 + %s170_s6]]  ;;  %s52_s15 = sadd.s32 1, %s170_s6 }
  0x12   : > { %s53_s16 = sld [smem:[#allocation4 + %s52_s15]]  ;;  %s57_s17 = sadd.s32 2, %s170_s6 }
  0x13   : > { %s58_s18 = sld [smem:[#allocation4 + %s57_s17]]  ;;  %s62_s19 = sadd.s32 3, %s170_s6 }
  0x14   : > { %s63_s20 = sld [smem:[#allocation4 + %s62_s19]]  ;;  %s67_s21 = sadd.s32 4, %s170_s6 }
  0x15   : > { %s68_s22 = sld [smem:[#allocation4 + %s67_s21]]  ;;  %s72_s23 = sadd.s32 5, %s170_s6 }
  0x16   : > { %s73_s24 = sld [smem:[#allocation4 + %s72_s23]]  ;;  %s77_s25 = sadd.s32 6, %s170_s6 }
  0x17   : > { %s49_s28 = scalar_lea.vmem %s315_s1, %s48_s7  ;;  %s78_s29 = sld [smem:[#allocation4 + %s77_s25]] }
  0x18   : > { %v50_v3 = vld [vmem:[%s49_s28] sm:$0x1]  ;;  %s54_s10 = scalar_lea.vmem %s315_s1, %s53_s16  ;;  %s82_s11 = sadd.s32 7, %s170_s6 }
  0x19   : > { %v55_v4 = vld [vmem:[%s54_s10] sm:$0x1]  ;;  %s59_s14 = scalar_lea.vmem %s315_s1, %s58_s18  ;;  %s83_s0 = sld [smem:[#allocation4 + %s82_s11]] }
  0x1a   : > { %v56_v5 = vadd.f32 %v55_v4, %v50_v3  ;;  %v60_v6 = vld [vmem:[%s59_s14] sm:$0x1]  ;;  %s64_s19 = scalar_lea.vmem %s315_s1, %s63_s20 }
  0x1b   : > { %v65_v7 = vld [vmem:[%s64_s19] sm:$0x1]  ;;  %s69_s23 = scalar_lea.vmem %s315_s1, %s68_s22  ;;  %s87_s22 = scalar_lea.vmem [#allocation2], %s208_s5 }
  0x1c   : > { %v61_v8 = vadd.f32 %v60_v6, %v56_v5  ;;  %s74_s25 = scalar_lea.vmem %s315_s1, %s73_s24  ;;  %v70_v9 = vld [vmem:[%s69_s23] sm:$0x1]  ;;  %s45_s5 = sadd.s32 1, %s208_s5  }
  0x1d   : > { %s79_s27 = scalar_lea.vmem %s315_s1, %s78_s29  ;;  %v75_v11 = vld [vmem:[%s74_s25] sm:$0x1]  ;;  %p42_p5 = scmp.ge.s32.totalorder %s45_s5, 2  }
  0x1e   : > { %v66_v10 = vadd.f32 %v65_v7, %v61_v8  ;;  %v80_v13 = vld [vmem:[%s79_s27] sm:$0x1]  ;;  %v133_v30 = vlaneseq (%p42_p5)  ;;  %vm139_vm2 = vcmask (%p42_p5), 402432   ;;  %v111_v45 = vld [vmem:[#allocation6] sm:$0x1] (%p42_p5)  ;;  %vm150_vm4 = vcmask (%p42_p5), 1024  }
  0x1f   : > { %s84_s30 = scalar_lea.vmem %s315_s1, %s83_s0  ;;  %v91_v18 = vld [vmem:[%s317_s3] sm:$0x1] (%p42_p5)  ;;  %v113_v46 = vand.u32 (%p42_p5), 2147483647, %v111_v45  ;;  %v112_v57 = vmax.f32 (%p42_p5), %v111_v45, 0.0 }
  0x20   : > { %v71_v12 = vadd.f32 %v70_v9, %v66_v10  ;;  %v85_v15 = vld [vmem:[%s84_s30] sm:$0x1]  ;;  %v93_v19 = vand.u32 (%p42_p5), 2147483647, %v91_v18  ;;  %v92_v29 = vmax.f32 (%p42_p5), %v91_v18, 0.0  ;;  %v134_v35 = vshrl.u32 (%p42_p5), %v133_v30, 7 }
  0x21   :  { %v107_v33 = vld [vmem:[%s318_s4] sm:$0x1] (%p42_p5)  ;;  %v114_v47 = vsub.f32 (%p42_p5), 0.0, %v113_v46  ;;  %v127_v60 = vld [vmem:[#allocation7] sm:$0x1] (%p42_p5) }
  0x22   : > { %v76_v14 = vadd.f32 %v75_v11, %v71_v12  ;;  %v94_v20 = vsub.f32 (%p42_p5), 0.0, %v93_v19  ;;  %v90_v36 = vld [vmem:[%s316_s2] sm:$0x1] (%p42_p5)  ;;  %v135_v39 = vsub.s32 (%p42_p5), 0, %v134_v35  ;;  %v110_v62 = vld [vmem:[#allocation5] sm:$0x1] (%p42_p5) }
  0x23   :  { %v115_v48 = vmul.f32 (%p42_p5), 1.442695, %v114_v47 }
  0x24   : > { %v81_v16 = vadd.f32 %v80_v13, %v76_v14  ;;  %44 = sbr.rel (!%p42_p5) target bundleno = 16 (0x10), region = 64  ;;  %v95_v21 = vmul.f32 (%p42_p5), 1.442695, %v94_v20 }
  0x26   : > { %v86_v17 = vadd.f32 %v85_v15, %v81_v16  ;;  %180 = vpow2.f32 (%p42_p5), %v95_v21 }
  0x28   : > { %89 = vst.msk [vmem:[%s87_s22] sm:$0x1] %vm88_vm0, %v86_v17 }
  0x2f   :  { %v131_v41 = vld [vmem:[#allocation2] sm:$0x3] }
  0x33   :  { %v181_v22 = vpop.eup %180 }
  0x34   :  { %v97_v23 = vadd.f32 1.0, %v181_v22  ;;  %v100_v24 = vmul.f32 -0.5, %v181_v22  ;;  %v103_v26 = vand.u32 2147483647, %v181_v22 }
  0x36   :  { %182 = vlog2.f32 %v97_v23  ;;  %v101_v25 = vadd.f32 1.0, %v100_v24  ;;  %vm104_vm1 = vcmp.lt.f32.partialorder %v103_v26, 0.0004427343 }
  0x37   :  { %184 = vpow2.f32 %v115_v48 }
  0x38   :  { %v102_v27 = vmul.f32 %v181_v22, %v101_v25 }
  0x43   :  { %v183_v28 = vpop.eup %182 }
  0x44   :  { %v99_v31 = vmul.f32 0.6931472, %v183_v28  ;;  %v185_v49 = vpop.eup %184 }
  0x45   :  { %v117_v50 = vadd.f32 1.0, %v185_v49  ;;  %v120_v51 = vmul.f32 -0.5, %v185_v49  ;;  %v123_v54 = vand.u32 2147483647, %v185_v49 }
  0x46   :  { %v105_v32 = vsel %vm104_vm1, %v102_v27, %v99_v31 }
  0x47   :  { %v106_v34 = vadd.f32 %v105_v32, %v92_v29  ;;  %186 = vlog2.f32 %v117_v50  ;;  %v121_v52 = vadd.f32 1.0, %v120_v51  ;;  %vm124_vm3 = vcmp.lt.f32.partialorder %v123_v54, 0.0004427343 }
  0x49   :  { %v108_v37 = vmul.f32 %v107_v33, %v106_v34  ;;  %v122_v56 = vmul.f32 %v185_v49, %v121_v52 }
  0x4b   :  { %v109_v38 = vadd.f32 %v108_v37, %v90_v36 }
  0x4d   :  { %v130_v40 = vmul.f32 0.125, %v109_v38 }
  0x4f   :  { %v136_v42 = vrot.slane %v130_v40, %v135_v39 }
  0x51   :  { %v138_v43 = vmul.f32 %v136_v42, %v131_v41 }
  0x53   :  { %v140_v44 = vsel %vm139_vm2, %v138_v43, 0.0 }
  0x54   :  { %141 = vadd.xlane.f32.xlu0 %v140_v44  ;;  %v187_v53 = vpop.eup %186 }
  0x55   :  { %v119_v55 = vmul.f32 0.6931472, %v187_v53 }
  0x57   :  { %v125_v58 = vsel %vm124_vm3, %v122_v56, %v119_v55 }
  0x58   :  { %v126_v59 = vadd.f32 %v125_v58, %v112_v57 }
  0x5a   :  { %v128_v61 = vmul.f32 %v127_v60, %v126_v59 }
  0x5c   :  { %v129_v63 = vadd.f32 %v128_v61, %v110_v62 }
  0x5e   :  { %v147_v0 = vrot.slane %v129_v63, %v135_v39 }
  0xdd   :  { %v142_v1 = vpop.xlane.xlu0 %141 }
  0xde   :  { %v149_v2 = vadd.f32 %v147_v0, %v142_v1 }
  0xe0   :  { %151 = vst.msk [vmem:[%s319_s8] sm:$0x3] %vm150_vm4, %v149_v2 }

</bundles_post_ra>
